<compile_context>
chip_gen: v5e
topology: v5e:2x2
jax: 0.10.0
libtpu: 0.0.40
codegen_flags: <defaults>
</compile_context>

<pallas_src>
import functools
import math

import jax
import jax.numpy as jnp
from jax import lax
from jax.experimental import pallas as pl
from jax.experimental.pallas import tpu as pltpu

LN_EPS = 1e-5


def _round_up(a, b):
    return (a + b - 1) // b * b


def _cdiv(a, b):
    return (a + b - 1) // b


@functools.lru_cache(maxsize=None)
def _chip_is_v7():
    try:
        kind = jax.devices()[0].device_kind.lower().replace(" ", "")
    except Exception:
        kind = ""
    return ("v7" in kind) or kind.startswith("tpu7")


def lay_block_drt(x, gamma, beta, w, b, *, tm=512, mxu_dtype=jnp.bfloat16):
    """LayBlockDRT forward (default config: LN -> Dense+ReLU -> zeroes -> +residual).

    x: (..., D) float32.  Returns {'out': x.shape f32, 'zeroes': (D,) int8}.
    """
    # TODO(synk): do_scaled_dns=True (two stacked denses) and nonzero dropouts are not
    # implemented; this kernel covers the module's default configuration only.
    orig_shape = x.shape
    D = int(orig_shape[-1])
    M = int(math.prod(orig_shape[:-1]))

    is_v7 = _chip_is_v7()
    w_item = jnp.dtype(mxu_dtype).itemsize

    # ---------------- generation-aware VMEM budgets ----------------
    if is_v7:
        budget = 40 << 20          # per-TensorCore tiling budget (64 MiB physical)
        vmem_cap = 56 << 20        # leave headroom for Mosaic internal scratch
    else:
        budget = 96 << 20          # v5e / v6e have 128 MiB VMEM
        vmem_cap = 110 << 20

    # ---------------- output-column tiling of the dense weight ----------------
    n_col, tn = 1, D
    if D % 128 == 0:
        while 2 * D * tn * w_item > budget // 3 and tn % 256 == 0:
            tn //= 2
            n_col *= 2
    # TODO(synk): widths that are not a multiple of 128 keep the full (D, D) weight block;
    # such widths would need lane padding before they could be column-tiled.
    has_xcol = n_col > 1

    # ---------------- row tile size from the VMEM budget ----------------
    per_row = 2 * D * 4 + 2 * tn * 4 + (2 * tn * 4 if has_xcol else 0)   # x, out (+x cols)
    fixed = (2 * D * tn * w_item            # weight block (double-buffered by the pipeline)
             + 4 * D * 4 + 2 * tn * 4       # gamma, beta, bias
             + 2 * 8 * tn * 4               # activation-map block
             + (1 << 20))                   # misc slack
    max_tm = max(8, ((budget - fixed) // per_row) // 8 * 8)
    tm_eff = max(8, min(_round_up(tm, 8), _round_up(M, 8), max_tm))

    # ---------------- shard (TensorCore) axis ----------------
    n_blocks = _cdiv(M, tm_eff)
    n_shards = 1
    if is_v7 and n_blocks >= 2:
        n_shards = 2
        if n_blocks % 2:
            # re-tile so the shards split evenly (avoids fully out-of-bounds row blocks)
            tm_try = _round_up(_cdiv(M, n_blocks + 1), 8)
            if _cdiv(M, tm_try) % 2 == 0:
                tm_eff = tm_try
                n_blocks = _cdiv(M, tm_eff)
            else:
                n_shards = 1
    bps = n_blocks // n_shards
    ragged_rows = (M % tm_eff) != 0
    last_block = n_blocks - 1

    # ---------------- operands (no padding, no extra HBM round trips) ----------------
    x2 = x.reshape(M, D).astype(jnp.float32)
    g2 = gamma.astype(jnp.float32).reshape(1, D)
    bt2 = beta.astype(jnp.float32).reshape(1, D)
    w2 = w.astype(mxu_dtype)                      # cast straight to the MXU dtype, no pad
    bs2 = b.astype(jnp.float32).reshape(1, D)

    # ---------------- kernel ----------------
    def kernel(*refs):
        if has_xcol:
            x_ref, xcol_ref, g_ref, bt_ref, w_ref, bs_ref, out_ref, act_ref = refs
        else:
            x_ref, g_ref, bt_ref, w_ref, bs_ref, out_ref, act_ref = refs
            xcol_ref = None
        s = pl.program_id(0)       # TensorCore shard
        c = pl.program_id(1)       # output-column block of the dense weight
        j = pl.program_id(2)       # row block within the shard (zeroes accumulation axis)

        x_blk = x_ref[...]                                              # (tm, D) f32

        # LayerNorm over the feature axis (eps = 1e-5, elementwise affine).
        inv_d = jnp.float32(1.0 / D)
        mean = jnp.sum(x_blk, axis=-1, keepdims=True) * inv_d
        xc = x_blk - mean
        var = jnp.sum(xc * xc, axis=-1, keepdims=True) * inv_d
        xn = xc * lax.rsqrt(var + LN_EPS) * g_ref[...] + bt_ref[...]

        # LayDense: MXU matmul (f32 accumulate) + bias + ReLU.
        y = jnp.dot(xn.astype(mxu_dtype), w_ref[...],
                    preferred_element_type=jnp.float32) + bs_ref[...]
        y = jnp.maximum(y, 0.0)                                         # (tm, tn) f32

        # zeroes(): per-feature running max of the (non-negative) activations.
        @pl.when(j == 0)
        def _():
            act_ref[...] = jnp.zeros(act_ref.shape, act_ref.dtype)

        def _acc(tile):
            # whole-vreg VPU max only; final 8-row reduce happens outside the kernel.
            act_ref[...] = jnp.maximum(
                act_ref[...], jnp.max(tile.reshape(tm_eff // 8, 8, tn), axis=0))

        if ragged_rows:
            is_last = (s * bps + j) == last_block

            @pl.when(jnp.logical_not(is_last))
            def _():
                _acc(y)

            @pl.when(is_last)
            def _():
                row = lax.broadcasted_iota(jnp.int32, (tm_eff, 1), 0)
                valid = (s * bps + j) * tm_eff + row < M
                # select (not multiply) so garbage rows of the partial block cannot
                # poison the max even if they are NaN/Inf.
                _acc(jnp.where(valid, y, 0.0))
        else:
            _acc(y)

        # LayRES residual (res_dropout=0).  Out-of-bounds rows of the last block are
        # dropped by the pipeline on write-back.
        x_res = xcol_ref[...] if has_xcol else x_blk
        out_ref[...] = y + x_res

    # ---------------- specs / pallas_call ----------------
    in_specs = [pl.BlockSpec((tm_eff, D), lambda s, c, j: (s * bps + j, 0))]   # x row tile
    args = [x2]
    if has_xcol:
        in_specs.append(pl.BlockSpec((tm_eff, tn), lambda s, c, j: (s * bps + j, c)))
        args.append(x2)                                                  # residual columns
    in_specs += [
        pl.BlockSpec((1, D), lambda s, c, j: (0, 0)),       # LN gamma
        pl.BlockSpec((1, D), lambda s, c, j: (0, 0)),       # LN beta
        pl.BlockSpec((D, tn), lambda s, c, j: (0, c)),      # dense W (pipelined, 1 fetch / col)
        pl.BlockSpec((1, tn), lambda s, c, j: (0, c)),      # dense bias
    ]
    args += [g2, bt2, w2, bs2]

    out_specs = [
        pl.BlockSpec((tm_eff, tn), lambda s, c, j: (s * bps + j, c)),    # out row/col tile
        pl.BlockSpec((8, tn), lambda s, c, j: (s, c)),                   # per-shard activation map
    ]
    out_shape = (jax.ShapeDtypeStruct((M, D), jnp.float32),
                 jax.ShapeDtypeStruct((n_shards * 8, D), jnp.float32))

    grid_spec = pltpu.PrefetchScalarGridSpec(
        num_scalar_prefetch=0,
        grid=(n_shards, n_col, bps),
        in_specs=in_specs,
        out_specs=out_specs,
    )

    needed_vmem = fixed + per_row * tm_eff
    vmem_limit = int(min(vmem_cap, max(needed_vmem + (4 << 20), 24 << 20)))

    cost = pl.CostEstimate(
        flops=2 * M * D * D,
        transcendentals=M,
        bytes_accessed=(n_col + 1) * M * D * 4 + D * D * w_item,
    )

    def _call(dim_sem):
        return pl.pallas_call(
            kernel,
            out_shape=out_shape,
            grid_spec=grid_spec,
            compiler_params=pltpu.CompilerParams(
                dimension_semantics=dim_sem, vmem_limit_bytes=vmem_limit),
            cost_estimate=cost,
        )(*args)

    if is_v7 and n_shards == 2:
        # Use both v7x TensorCores; fall back to plain megacore semantics if the compiler
        # rejects core-parallel partitioning for this grid.
        try:
            out2, act = _call((pltpu.CORE_PARALLEL, pltpu.ARBITRARY, pltpu.ARBITRARY))
        except Exception:
            out2, act = _call(("parallel", "arbitrary", "arbitrary"))
    else:
        out2, act = _call(("arbitrary", "arbitrary", "arbitrary"))

    out = out2.reshape(orig_shape)
    ever_active = jnp.max(act, axis=0)          # tiny (n_shards*8, D) reduce outside kernel
    zeroes = (ever_active == 0.0).astype(jnp.int8)
    return {"out": out, "zeroes": zeroes}


def _reference(x, gamma, beta, w, b):
    """Pure-JAX f32 reference of LayBlockDRT forward (default config)."""
    xf = x.astype(jnp.float32)
    mean = jnp.mean(xf, axis=-1, keepdims=True)
    var = jnp.mean((xf - mean) ** 2, axis=-1, keepdims=True)
    xn = (xf - mean) * lax.rsqrt(var + LN_EPS) * gamma + beta
    y = jnp.maximum(xn @ w + b, 0.0)
    red_axes = tuple(range(xf.ndim - 1))
    zs = (jnp.sum((y > 0).astype(jnp.int32), axis=red_axes) == 0).astype(jnp.int8)
    return {"out": y + xf, "zeroes": zs}


if __name__ == "__main__":
    def run_case(B, S, D, tm, mxu_dtype=jnp.bfloat16, atol=2e-2, rtol=2e-2):
        key = jax.random.PRNGKey(0)
        kx, kg, kb, kw, kbb = jax.random.split(key, 5)
        x = jax.random.normal(kx, (B, S, D), dtype=jnp.float32)
        gamma = 1.0 + 0.01 * jax.random.normal(kg, (D,), dtype=jnp.float32)   # LN weight
        beta = 0.01 * jax.random.normal(kb, (D,), dtype=jnp.float32)          # LN bias
        w = jax.random.normal(kw, (D, D), dtype=jnp.float32) / jnp.sqrt(D)    # dense weight
        b = 0.01 * jax.random.normal(kbb, (D,), dtype=jnp.float32)            # dense bias
        b = b.at[-3:].set(-10.0)   # force a few never-activated features so zeroes==1 appears

        res = lay_block_drt(x, gamma, beta, w, b, tm=tm, mxu_dtype=mxu_dtype)
        jax.block_until_ready(res["out"])
        jax.block_until_ready(res["zeroes"])

        ref = _reference(x, gamma, beta, w, b)
        assert res["out"].shape == (B, S, D) and res["out"].dtype == jnp.float32
        assert res["zeroes"].shape == (D,) and res["zeroes"].dtype == jnp.int8
        assert jnp.allclose(res["out"], ref["out"], atol=atol, rtol=rtol), (B, S, D)
        assert jnp.array_equal(res["zeroes"], ref["zeroes"]), (B, S, D)

    run_case(2, 8, 32, tm=512)                          # D < 128, single block
    run_case(2, 37, 96, tm=32)                          # ragged row blocks, no wrapper padding
    run_case(2, 64, 128, tm=64)                         # lane-dense D, multi-block grid
    run_case(2, 37, 96, tm=32, mxu_dtype=jnp.float32)   # f32 dense path (closer parity option)
    print("KERNEL_OK")
</pallas_src>

<mosaic_0001>
module attributes {stable_mosaic.version = 11 : i64} {
  func.func @kernel(%arg0: i32, %arg1: i32, %arg2: i32, %arg3: memref<16x32xf32, #tpu.memory_space<vmem>>, %arg4: memref<1x32xf32, #tpu.memory_space<vmem>>, %arg5: memref<1x32xf32, #tpu.memory_space<vmem>>, %arg6: memref<32x32xbf16, #tpu.memory_space<vmem>>, %arg7: memref<1x32xf32, #tpu.memory_space<vmem>>, %arg8: memref<16x32xf32, #tpu.memory_space<vmem>>, %arg9: memref<8x32xf32, #tpu.memory_space<vmem>>) attributes {dimension_semantics = [#tpu.dimension_semantics<arbitrary>, #tpu.dimension_semantics<arbitrary>, #tpu.dimension_semantics<arbitrary>], iteration_bounds = array<i64: 1, 1, 1>, scalar_prefetch = 0 : i64, scratch_operands = 0 : i64, tpu.core_type = #tpu.core_type<tc>, window_params = [{transform_indices = @transform_0, window_bounds = array<i64: 16, 32>}, {pipeline_mode = #tpu.pipeline_mode<synchronous>, transform_indices = @transform_1, window_bounds = array<i64: 1, 32>}, {pipeline_mode = #tpu.pipeline_mode<synchronous>, transform_indices = @transform_2, window_bounds = array<i64: 1, 32>}, {transform_indices = @transform_3, window_bounds = array<i64: 32, 32>}, {transform_indices = @transform_4, window_bounds = array<i64: 1, 32>}, {transform_indices = @transform_5, window_bounds = array<i64: 16, 32>}, {transform_indices = @transform_6, window_bounds = array<i64: 8, 32>}]} {
    %c0 = arith.constant 0 : index
    %c0_0 = arith.constant 0 : index
    %0 = vector.load %arg3[%c0, %c0_0] : memref<16x32xf32, #tpu.memory_space<vmem>>, vector<16x32xf32>
    %cst = arith.constant dense<0.000000e+00> : vector<16xf32>
    %1 = vector.multi_reduction <add>, %0, %cst [1] : vector<16x32xf32> to vector<16xf32>
    %2 = vector.shape_cast %1 : vector<16xf32> to vector<16x1xf32>
    %cst_1 = arith.constant 3.125000e-02 : f32
    %3 = vector.broadcast %cst_1 : f32 to vector<16x1xf32>
    %4 = arith.mulf %2, %3 : vector<16x1xf32>
    %5 = vector.broadcast %4 : vector<16x1xf32> to vector<16x32xf32>
    %6 = arith.subf %0, %5 : vector<16x32xf32>
    %7 = arith.mulf %6, %6 : vector<16x32xf32>
    %cst_2 = arith.constant dense<0.000000e+00> : vector<16xf32>
    %8 = vector.multi_reduction <add>, %7, %cst_2 [1] : vector<16x32xf32> to vector<16xf32>
    %9 = vector.shape_cast %8 : vector<16xf32> to vector<16x1xf32>
    %cst_3 = arith.constant 3.125000e-02 : f32
    %10 = vector.broadcast %cst_3 : f32 to vector<16x1xf32>
    %11 = arith.mulf %9, %10 : vector<16x1xf32>
    %cst_4 = arith.constant 9.99999974E-6 : f32
    %12 = vector.broadcast %cst_4 : f32 to vector<16x1xf32>
    %13 = arith.addf %11, %12 : vector<16x1xf32>
    %14 = math.rsqrt %13 : vector<16x1xf32>
    %15 = vector.broadcast %14 : vector<16x1xf32> to vector<16x32xf32>
    %16 = arith.mulf %6, %15 : vector<16x32xf32>
    %c0_5 = arith.constant 0 : index
    %c0_6 = arith.constant 0 : index
    %17 = vector.load %arg4[%c0_5, %c0_6] : memref<1x32xf32, #tpu.memory_space<vmem>>, vector<1x32xf32>
    %18 = vector.broadcast %17 : vector<1x32xf32> to vector<16x32xf32>
    %19 = arith.mulf %16, %18 : vector<16x32xf32>
    %c0_7 = arith.constant 0 : index
    %c0_8 = arith.constant 0 : index
    %20 = vector.load %arg5[%c0_7, %c0_8] : memref<1x32xf32, #tpu.memory_space<vmem>>, vector<1x32xf32>
    %21 = vector.broadcast %20 : vector<1x32xf32> to vector<16x32xf32>
    %22 = arith.addf %19, %21 : vector<16x32xf32>
    %23 = arith.truncf %22 : vector<16x32xf32> to vector<16x32xbf16>
    %c0_9 = arith.constant 0 : index
    %c0_10 = arith.constant 0 : index
    %24 = vector.load %arg6[%c0_9, %c0_10] : memref<32x32xbf16, #tpu.memory_space<vmem>>, vector<32x32xbf16>
    %cst_11 = arith.constant dense<0.000000e+00> : vector<16x32xf32>
    %25 = tpu.matmul %23, %24, %cst_11 {dimension_numbers = #tpu.dot_dimension_numbers<[1], [0], [0], [1], [0, 0, 1, 1], [], []>} : vector<16x32xbf16>, vector<32x32xbf16>, vector<16x32xf32> -> vector<16x32xf32>
    %c0_12 = arith.constant 0 : index
    %c0_13 = arith.constant 0 : index
    %26 = vector.load %arg7[%c0_12, %c0_13] : memref<1x32xf32, #tpu.memory_space<vmem>>, vector<1x32xf32>
    %27 = vector.broadcast %26 : vector<1x32xf32> to vector<16x32xf32>
    %28 = arith.addf %25, %27 : vector<16x32xf32>
    %cst_14 = arith.constant 0.000000e+00 : f32
    %29 = vector.broadcast %cst_14 : f32 to vector<16x32xf32>
    %30 = arith.maximumf %28, %29 : vector<16x32xf32>
    %c0_i32 = arith.constant 0 : i32
    %31 = arith.cmpi eq, %arg2, %c0_i32 : i32
    %32 = arith.extui %31 : i1 to i32
    %c0_i32_15 = arith.constant 0 : i32
    %33 = arith.cmpi ne, %32, %c0_i32_15 : i32
    scf.if %33 {
      %cst_23 = arith.constant 0.000000e+00 : f32
      %41 = vector.broadcast %cst_23 : f32 to vector<8x32xf32>
      %c0_24 = arith.constant 0 : index
      %c0_25 = arith.constant 0 : index
      %42 = vector.load %arg9[%c0_24, %c0_25] : memref<8x32xf32, #tpu.memory_space<vmem>>, vector<8x32xf32>
      tpu.vector_store %arg9[%c0_24, %c0_25], %41 {strides = array<i32>} : memref<8x32xf32, #tpu.memory_space<vmem>>, vector<8x32xf32>,
    } else {
    }
    %c0_16 = arith.constant 0 : index
    %c0_17 = arith.constant 0 : index
    %34 = vector.load %arg9[%c0_16, %c0_17] : memref<8x32xf32, #tpu.memory_space<vmem>>, vector<8x32xf32>
    %35 = vector.shape_cast %30 : vector<16x32xf32> to vector<2x8x32xf32>
    %cst_18 = arith.constant dense<0xFF800000> : vector<8x32xf32>
    %36 = vector.multi_reduction <maximumf>, %35, %cst_18 [0] : vector<2x8x32xf32> to vector<8x32xf32>
    %37 = arith.maximumf %34, %36 : vector<8x32xf32>
    %c0_19 = arith.constant 0 : index
    %c0_20 = arith.constant 0 : index
    %38 = vector.load %arg9[%c0_19, %c0_20] : memref<8x32xf32, #tpu.memory_space<vmem>>, vector<8x32xf32>
    tpu.vector_store %arg9[%c0_19, %c0_20], %37 {strides = array<i32>} : memref<8x32xf32, #tpu.memory_space<vmem>>, vector<8x32xf32>,
    %39 = arith.addf %30, %0 : vector<16x32xf32>
    %c0_21 = arith.constant 0 : index
    %c0_22 = arith.constant 0 : index
    %40 = vector.load %arg8[%c0_21, %c0_22] : memref<16x32xf32, #tpu.memory_space<vmem>>, vector<16x32xf32>
    tpu.vector_store %arg8[%c0_21, %c0_22], %39 {strides = array<i32>} : memref<16x32xf32, #tpu.memory_space<vmem>>, vector<16x32xf32>,
    return
  }
  func.func @transform_0(%arg0: i32, %arg1: i32, %arg2: i32) -> (i32, i32) {
    %c1_i32 = arith.constant 1 : i32
    %0 = arith.muli %arg0, %c1_i32 : i32
    %1 = arith.addi %0, %arg2 : i32
    %c0_i32 = arith.constant 0 : i32
    %c0_i32_0 = arith.constant 0 : i32
    return %1, %c0_i32 : i32, i32
  }
  func.func @transform_1(%arg0: i32, %arg1: i32, %arg2: i32) -> (i32, i32) {
    %c0_i32 = arith.constant 0 : i32
    %c0_i32_0 = arith.constant 0 : i32
    %c0_i32_1 = arith.constant 0 : i32
    return %c0_i32, %c0_i32_0 : i32, i32
  }
  func.func @transform_2(%arg0: i32, %arg1: i32, %arg2: i32) -> (i32, i32) {
    %c0_i32 = arith.constant 0 : i32
    %c0_i32_0 = arith.constant 0 : i32
    %c0_i32_1 = arith.constant 0 : i32
    return %c0_i32, %c0_i32_0 : i32, i32
  }
  func.func @transform_3(%arg0: i32, %arg1: i32, %arg2: i32) -> (i32, i32) {
    %c0_i32 = arith.constant 0 : i32
    %c0_i32_0 = arith.constant 0 : i32
    return %c0_i32, %arg1 : i32, i32
  }
  func.func @transform_4(%arg0: i32, %arg1: i32, %arg2: i32) -> (i32, i32) {
    %c0_i32 = arith.constant 0 : i32
    %c0_i32_0 = arith.constant 0 : i32
    return %c0_i32, %arg1 : i32, i32
  }
  func.func @transform_5(%arg0: i32, %arg1: i32, %arg2: i32) -> (i32, i32) {
    %c1_i32 = arith.constant 1 : i32
    %0 = arith.muli %arg0, %c1_i32 : i32
    %1 = arith.addi %0, %arg2 : i32
    %c0_i32 = arith.constant 0 : i32
    return %1, %arg1 : i32, i32
  }
  func.func @transform_6(%arg0: i32, %arg1: i32, %arg2: i32) -> (i32, i32) {
    %c0_i32 = arith.constant 0 : i32
    return %arg0, %arg1 : i32, i32
  }
}

</mosaic_0001>

<bundles_post_ra>
// kernel: tpu_custom_call.1
= control target key start
LH: loop header
LB: loop body
LE: loop exit
PB: predicated region body
PF: predicated region fallthrough
CT: control target
= control target key end

     0   :  { %12 = vsyncpa [#allocation3], 0  ;;  %s481_s0 = inlined_call_operand.hbm [shape: f32[16,32], index: 0, kind: input, shape index: {}]   ;;  %s482_s1 = inlined_call_operand.hbm [shape: f32[1,32], index: 1, kind: input, shape index: {}]   ;;  %s483_s2 = inlined_call_operand.vmem [shape: f32[1,32], index: 2, kind: input, shape index: {}]   ;;  %s484_s3 = inlined_call_operand.hbm [shape: bf16[32,32], index: 3, kind: input, shape index: {}]   ;;  %s485_s4 = inlined_call_operand.vmem [shape: f32[1,32], index: 4, kind: input, shape index: {}]   ;;  %s486_s5 = inlined_call_operand.hbm [shape: f32[16,32], index: 5, kind: output, shape index: {0}]   ;;  %s487_s6 = inlined_call_operand.hbm [shape: f32[8,32], index: 6, kind: output, shape index: {1}]  }
   0x1   :  { %13 = vsyncpa [#allocation6], 0 }
   0x2   :  { %14 = vsyncpa [#allocation4], 0  ;;  %s38_s23 = sshll.u32 %s482_s1, 4  ;;  %s39_s23 = int_to_ptr.hbm [resolvable:$true] %s38_s23 }
   0x3   :  { %15 = vsyncpa [#allocation10], 0  ;;  %s388_s24 = smov [#allocation5]   ;;  %s24_s28 = sshll.u32 %s481_s0, 4  ;;  %s25_s28 = int_to_ptr.hbm [resolvable:$true] %s24_s28 }
   0x4   :  { %s40_s25 = sshll.u32 %s388_s24, 4  ;;  %s389_s29 = smov [#allocation2]   ;;  %s41_s25 = int_to_ptr.vmem [resolvable:$true] %s40_s25 }
   0x5   :  { %43 = dma.hbm_to_vmem [thread:$0]  %s39_s23, 16, %s41_s25, [#allocation6]  }
   0x6   :  { %s26_s30 = sshll.u32 %s389_s29, 4  ;;  %s390_s7 = smov 128   ;;  %s27_s30 = int_to_ptr.vmem [resolvable:$true] %s26_s30 }
   0x7   :  { %s391_s8 = smov 8   ;;  %s50_s10 = sshll.u32 %s484_s3, 4  ;;  %s51_s10 = int_to_ptr.hbm [resolvable:$true] %s50_s10 }
   0x8   :  { %32 = dma.hbm_to_vmem [thread:$0]  %s25_s28, 256, %s27_s30, [#allocation3], %s390_s7, %s390_s7, %s391_s8  }
   0x9   :  { %s392_s11 = smov [#allocation7]   ;;  %s393_s0 = smov 64  }
   0xa   :  { %s52_s12 = sshll.u32 %s392_s11, 4  ;;  %s394_s13 = smov 4   ;;  %s53_s12 = int_to_ptr.vmem [resolvable:$true] %s52_s12 }
   0xb   :  { %58 = dma.hbm_to_vmem [thread:$0]  %s51_s10, 256, %s53_s12, [#allocation6], %s393_s0, %s393_s0, %s394_s13  }
   0xc   :  { %380 = dma.done.wait [#allocation3], 256  }
   0xd   :  { %381 = vsyncadd [#allocation3], 4294967040 }
   0xe   :  { %382 = dma.done.wait [#allocation6], 272  }
   0xf   :  { %383 = vsyncadd [#allocation6], 4294967024  ;;  %vm80_vm0 = vcmask 261120   ;;  %v445_v0 = vld [vmem:[#allocation2] sm:$0xff]  ;;  %v449_v2 = vld [vmem:[#allocation2 + $0x8] sm:$0xff]  ;;  %v395_v45 = vmov 0.0  }
  0x10   :  { %v81_v1 = vsel %vm80_vm0, %v445_v0, 0.0  ;;  %v84_v3 = vsel %vm80_vm0, %v449_v2, 0.0  ;;  %v242_v14 = vld [vmem:[#allocation7 + $0x8] sm:$0xff]  ;;  %v241_v16 = vld [vmem:[#allocation7] sm:$0xff]  ;;  %v253_v35 = vld [vmem:[#allocation5] ss:$0 sm:$0xff] }
  0x11   :  { %82 = vadd.xlane.f32.xlu0 %v81_v1  ;;  %167 = vmatpush.bf16.msra.mxu0 %v242_v14  ;;  %v254_v40 = vld [vmem:[%s483_s2] ss:$0 sm:$0xff]  ;;  %181 = vst.msk [vmem:[#allocation9] sm:$0xff] %vm80_vm0, %v395_v45  ;;  %s396_s2 = smov [#allocation8]   ;;  %s202_s20 = sshll.u32 %s486_s5, 4  ;;  %s203_s20 = int_to_ptr.hbm [resolvable:$true] %s202_s20 }
  0x12   :  { %v255_v46 = vld [vmem:[%s485_s4] ss:$0 sm:$0xff]  ;;  %s200_s17 = sshll.u32 %s396_s2, 4  ;;  %s397_s21 = smov [#allocation9]   ;;  %s201_s17 = int_to_ptr.vmem [resolvable:$true] %s200_s17 }
  0x13   :  { %s214_s22 = sshll.u32 %s397_s21, 4  ;;  %s216_s24 = sshll.u32 %s487_s6, 4  ;;  %s215_s22 = int_to_ptr.vmem [resolvable:$true] %s214_s22  ;;  %s217_s24 = int_to_ptr.hbm [resolvable:$true] %s216_s24 }
  0x15   :  { %168 = vmatpush.bf16.msra.mxu0 %v241_v16 }
  0x18   :  { %v182_v55 = vld [vmem:[#allocation9] sm:$0xff] }
  0x19   :  { %85 = vadd.xlane.f32.xlu0 %v84_v3 }
  0x84   :  { %v83_v4 = vpop.xlane.xlu0 %82 }
  0x85   :  { %v87_v5 = vmul.f32 0.03125, %v83_v4 }
  0x87   :  { %v89_v6 = vsub.f32 %v445_v0, %v87_v5 }
  0x89   :  { %v91_v7 = vmul.f32 %v89_v6, %v89_v6 }
  0x8b   :  { %v93_v8 = vsel %vm80_vm0, %v91_v7, 0.0 }
  0x8c   :  { %94 = vadd.xlane.f32.xlu1 %v93_v8  ;;  %v86_v9 = vpop.xlane.xlu0 %85 }
  0x8d   :  { %v88_v10 = vmul.f32 0.03125, %v86_v9 }
  0x8f   :  { %v90_v11 = vsub.f32 %v449_v2, %v88_v10 }
  0x91   :  { %v92_v12 = vmul.f32 %v90_v11, %v90_v11 }
  0x93   :  { %v96_v13 = vsel %vm80_vm0, %v92_v12, 0.0 }
  0x94   :  { %97 = vadd.xlane.f32.xlu1 %v96_v13 }
  0xff   :  { %v95_v15 = vpop.xlane.xlu1 %94 }
 0x100   :  { %v99_v17 = vmul.f32 0.03125, %v95_v15 }
 0x102   :  { %v101_v18 = vadd.f32 1e-05, %v99_v17 }
 0x104   :  { %256 = vrsqrt.f32 %v101_v18  ;;  %vm109_vm2 = vweird.f32 %v101_v18 }
 0x107   :  { %v98_v19 = vpop.xlane.xlu1 %97 }
 0x108   :  { %v100_v20 = vmul.f32 0.03125, %v98_v19 }
 0x10a   :  { %v257_v21 = vpop.eup %256  ;;  %v102_v22 = vadd.f32 1e-05, %v100_v20 }
 0x10b   :  { %v104_v23 = vmul.f32 %v257_v21, %v101_v18  ;;  %vm110_vm1 = vweird.f32 %v257_v21 }
 0x10c   :  { %258 = vrsqrt.f32 %v102_v22  ;;  %vm111_vm3 = vmor %vm109_vm2, %vm110_vm1  ;;  %vm119_vm5 = vweird.f32 %v102_v22 }
 0x10d   :  { %v105_v24 = vmul.f32 %v257_v21, %v104_v23 }
 0x10f   :  { %v106_v25 = vmul.f32 0.5, %v105_v24 }
 0x111   :  { %v107_v26 = vsub.f32 1.5, %v106_v25 }
 0x112   :  { %v259_v27 = vpop.eup %258 }
 0x113   :  { %v108_v28 = vmul.f32 %v257_v21, %v107_v26  ;;  %v114_v29 = vmul.f32 %v259_v27, %v102_v22  ;;  %vm120_vm4 = vweird.f32 %v259_v27 }
 0x114   :  { %vm121_vm6 = vmor %vm119_vm5, %vm120_vm4 }
 0x115   :  { %v115_v30 = vmul.f32 %v259_v27, %v114_v29  ;;  %v112_v31 = vsel %vm111_vm3, %v257_v21, %v108_v28 }
 0x116   :  { %v123_v34 = vmul.f32 %v112_v31, %v89_v6 }
 0x117   :  { %v116_v32 = vmul.f32 0.5, %v115_v30 }
 0x118   :  { %v129_v39 = vmul.f32 %v253_v35, %v123_v34 }
 0x119   :  { %v117_v33 = vsub.f32 1.5, %v116_v32 }
 0x11a   :  { %v135_v42 = vadd.f32 %v254_v40, %v129_v39 }
 0x11b   :  { %v118_v36 = vmul.f32 %v259_v27, %v117_v33 }
 0x11d   :  { %v122_v37 = vsel %vm121_vm6, %v259_v27, %v118_v36 }
 0x11e   :  { %v124_v38 = vmul.f32 %v122_v37, %v90_v11 }
 0x120   :  { %v130_v41 = vmul.f32 %v253_v35, %v124_v38 }
 0x122   :  { %v136_v43 = vadd.f32 %v254_v40, %v130_v41 }
 0x124   :  { %v137_v44 = vpack.c.bf16 %v136_v43, %v135_v42 }
 0x126   :  { %240 = vmatmul.msk.bf16.vlgmr.msra.gmra.mxu0 %vm80_vm0, %v137_v44 }
 0x1a3   :  { %v170_v47 = vpop.f32.mrf.mxu0 }
 0x1a4   :  { %v171_v48 = vadd.f32 %v255_v46, %v170_v47 }
 0x1a6   :  { %v175_v49 = vmax.f32 %v171_v48, 0.0 }
 0x1a8   :  { %v188_v50 = vadd.f32 %v175_v49, %v445_v0  ;;  %v183_v54 = vsel %vm80_vm0, %v175_v49, -inf }
 0x1aa   :  { %190 = vst.msk [vmem:[#allocation8] sm:$0xff] %vm80_vm0, %v188_v50 }
 0x1ab   :  { %v172_v51 = vpop.f32.mrf.mxu0 }
 0x1ac   :  { %v173_v52 = vadd.f32 %v255_v46, %v172_v51 }
 0x1ae   :  { %v176_v53 = vmax.f32 %v173_v52, 0.0 }
 0x1b0   :  { %v184_v56 = vsel %vm80_vm0, %v176_v53, -inf  ;;  %v189_v57 = vadd.f32 %v176_v53, %v449_v2 }
 0x1b1   :  { %v185_v58 = vmax.f32 %v183_v54, %v184_v56 }
 0x1b2   :  { %191 = vst.msk [vmem:[#allocation8 + $0x8] sm:$0xff] %vm80_vm0, %v189_v57 }
 0x1b3   :  { %v186_v59 = vmax.f32 %v182_v55, %v185_v58  ;;  %208 = dma.vmem_to_hbm [thread:$0]  %s201_s17, 256, %s203_s20, [#allocation4], %s390_s7, %s390_s7, %s391_s8  }
 0x1b5   :  { %187 = vst.msk [vmem:[#allocation9] sm:$0xff] %vm80_vm0, %v186_v59 }
 0x1b6   :  { %219 = dma.vmem_to_hbm [thread:$0]  %s215_s22, 128, %s217_s24, [#allocation10]  }
 0x1b7   :  { %384 = dma.done.wait [#allocation4], 256  }
 0x1b8   :  { %385 = vsyncadd [#allocation4], 4294967040 }
 0x1b9   :  { %386 = dma.done.wait [#allocation10], 128  }
 0x1ba   :  { %387 = vsyncadd [#allocation10], 4294967168 }
 0x1bb   :  { %228 = vsyncpa [#allocation3], 1 }
 0x1bc   :  { %229 = vsyncpa [#allocation6], 1 }
 0x1bd   :  { %230 = vsyncpa [#allocation4], 1 }
 0x1be   :  { %231 = vsyncpa [#allocation10], 1 }

</bundles_post_ra>
